<compile_context>
chip_gen: v7x
topology: tpu7x:2x2x1
jax: 0.10.0
libtpu: 0.0.40
codegen_flags: <defaults>
</compile_context>

<pallas_src>
import functools

import jax
import jax.numpy as jnp
from jax import lax
from jax.experimental import pallas as pl
from jax.experimental.pallas import tpu as pltpu

_LANE = 128


def _square_measure_kernel(x_ref, out_ref, sum_acc, sq_acc, *,
                           tile_rows, chunk_rows, valid_rows,
                           steps_per_part, needs_mask):
    """Per-part streaming reduction of sum(x) and sum(x^2)."""
    c = pl.program_id(0)          # megacore part axis ("parallel")
    i = pl.program_id(1)          # streaming / reduction axis ("arbitrary")

    @pl.when(i == 0)
    def _():
        sum_acc[...] = jnp.zeros_like(sum_acc)
        sq_acc[...] = jnp.zeros_like(sq_acc)

    # Logical global row offset of this block.  For the clamped tail block(s)
    # of the last part this may be >= valid_rows; those chunks are masked to 0.
    row_base = (c * steps_per_part + i) * tile_rows
    n_chunks = tile_rows // chunk_rows

    def body(k, carry):
        s1, s2 = carry
        start = pl.multiple_of(k * chunk_rows, chunk_rows)
        xk = x_ref[pl.ds(start, chunk_rows), :].astype(jnp.float32)
        if needs_mask:
            ok = (row_base + k * chunk_rows) < valid_rows
            xk = jnp.where(ok, xk, 0.0)          # select, so garbage never leaks
        return s1 + xk, s2 + xk * xk

    zero = jnp.zeros((chunk_rows, _LANE), jnp.float32)
    s1, s2 = lax.fori_loop(0, n_chunks, body, (zero, zero),
                           unroll=min(n_chunks, 8))

    # Touch the VMEM accumulators only once per grid step (2 vregs of traffic).
    sum_acc[...] += s1
    sq_acc[...] += s2

    @pl.when(i == pl.num_programs(1) - 1)
    def _():
        out_ref[0, 0] = jnp.sum(sum_acc[...])    # single small XLU reduce
        out_ref[0, 1] = jnp.sum(sq_acc[...])


def square_measure(x: jax.Array, *, max_tile_rows: int = 2048) -> jax.Array:
    """Pallas implementation of SquareMeasure.forward. Returns a scalar f32."""
    total_n = x.size
    if total_n < 2:
        raise ValueError("Need at least 2 elements for the unbiased variance.")

    itemsize = jnp.dtype(x.dtype).itemsize
    chunk_rows = max(8, 32 // itemsize)          # 8 (f32) / 16 (bf16) / 32 (i8)
    chunk_elems = chunk_rows * _LANE

    # Pad only up to a single chunk group (zeros contribute 0 to both sums).
    x_flat = x.reshape(-1)
    padded_n = -(-total_n // chunk_elems) * chunk_elems
    if padded_n > total_n:
        x_flat = jnp.pad(x_flat, (0, padded_n - total_n))
    valid_rows = padded_n // _LANE               # multiple of chunk_rows
    x2 = x_flat.reshape(valid_rows, _LANE)       # native dtype; cast in-kernel

    # Tile rows: as large as allowed, multiple of chunk_rows.
    tr = min(valid_rows, (max_tile_rows // chunk_rows) * chunk_rows)
    tr = max(tr, chunk_rows)
    total_blocks = pl.cdiv(valid_rows, tr)

    # Split the reduction across (up to) 2 TensorCores for v7x megacore;
    # harmless extra partial on single-TC v5e/v6e.
    num_parts = 2 if total_blocks >= 2 else 1
    steps_per_part = pl.cdiv(total_blocks, num_parts)
    needs_mask = (num_parts * steps_per_part * tr) != valid_rows

    def in_index_map(c, i):
        b = c * steps_per_part + i
        # Clamp logically out-of-range block indices back in range; their
        # contribution is masked to zero inside the kernel.
        return (jnp.minimum(b, total_blocks - 1), 0)

    kernel = functools.partial(
        _square_measure_kernel,
        tile_rows=tr, chunk_rows=chunk_rows, valid_rows=valid_rows,
        steps_per_part=steps_per_part, needs_mask=needs_mask)

    partials = pl.pallas_call(
        kernel,
        out_shape=jax.ShapeDtypeStruct((num_parts, 2), jnp.float32),
        grid=(num_parts, steps_per_part),
        in_specs=[pl.BlockSpec((tr, _LANE), in_index_map)],
        out_specs=pl.BlockSpec((1, 2), lambda c, i: (c, 0),
                               memory_space=pltpu.SMEM),
        scratch_shapes=[
            pltpu.VMEM((chunk_rows, _LANE), jnp.float32),   # sum accumulator
            pltpu.VMEM((chunk_rows, _LANE), jnp.float32),   # sum-sq accumulator
        ],
        compiler_params=pltpu.CompilerParams(
            dimension_semantics=("parallel", "arbitrary")),
    )(x2)

    # Tiny finalize in plain JAX: mean and unbiased variance (ddof=1).
    n = jnp.float32(total_n)
    s1 = jnp.sum(partials[:, 0])
    s2 = jnp.sum(partials[:, 1])
    mean = s1 / n
    var = (s2 - n * mean * mean) / (n - 1.0)
    return var * jnp.float32(0.5) - mean


def square_measure_ref(x: jax.Array) -> jax.Array:
    x = x.astype(jnp.float32)
    return jnp.var(x, ddof=1) * 0.5 - jnp.mean(x)


if __name__ == "__main__":
    key = jax.random.PRNGKey(0)
    # Module takes an arbitrary tensor; use an NCHW-like input [2, 4, 16, 16].
    x = jax.random.normal(key, (2, 4, 16, 16), dtype=jnp.float32)

    out = square_measure(x)          # SquareMeasure(a=1.0); no learned parameters
    out = jax.block_until_ready(out)

    ref = square_measure_ref(x)
    assert jnp.allclose(out, ref, rtol=1e-5, atol=1e-5), (out, ref)
    print("KERNEL_OK")
</pallas_src>

<mosaic_0001>
module attributes {stable_mosaic.version = 11 : i64} {
  func.func @_square_measure_kernel(%arg0: i32, %arg1: i32, %arg2: memref<16x128xf32, #tpu.memory_space<vmem>>, %arg3: memref<1x2xf32, #tpu.memory_space<smem>>, %arg4: memref<8x128xf32, #tpu.memory_space<vmem>>, %arg5: memref<8x128xf32, #tpu.memory_space<vmem>>) attributes {dimension_semantics = [#tpu.dimension_semantics<parallel>, #tpu.dimension_semantics<arbitrary>], iteration_bounds = array<i64: 1, 1>, scalar_prefetch = 0 : i64, scratch_operands = 2 : i64, tpu.core_type = #tpu.core_type<tc>, window_params = [{transform_indices = @transform_0, window_bounds = array<i64: 16, 128>}, {transform_indices = @transform_1, window_bounds = array<i64: 1, 2>}]} {
    %c0_i32 = arith.constant 0 : i32
    %0 = arith.cmpi eq, %arg1, %c0_i32 : i32
    %1 = arith.extui %0 : i1 to i32
    %c0_i32_0 = arith.constant 0 : i32
    %2 = arith.cmpi ne, %1, %c0_i32_0 : i32
    scf.if %2 {
      %cst_14 = arith.constant 0.000000e+00 : f32
      %27 = vector.broadcast %cst_14 : f32 to vector<8x128xf32>
      %c0_15 = arith.constant 0 : index
      %c0_16 = arith.constant 0 : index
      %28 = vector.load %arg4[%c0_15, %c0_16] : memref<8x128xf32, #tpu.memory_space<vmem>>, vector<8x128xf32>
      tpu.vector_store %arg4[%c0_15, %c0_16], %27 {strides = array<i32>} : memref<8x128xf32, #tpu.memory_space<vmem>>, vector<8x128xf32>,
      %cst_17 = arith.constant 0.000000e+00 : f32
      %29 = vector.broadcast %cst_17 : f32 to vector<8x128xf32>
      %c0_18 = arith.constant 0 : index
      %c0_19 = arith.constant 0 : index
      %30 = vector.load %arg5[%c0_18, %c0_19] : memref<8x128xf32, #tpu.memory_space<vmem>>, vector<8x128xf32>
      tpu.vector_store %arg5[%c0_18, %c0_19], %29 {strides = array<i32>} : memref<8x128xf32, #tpu.memory_space<vmem>>, vector<8x128xf32>,
    } else {
    }
    %cst = arith.constant 0.000000e+00 : f32
    %3 = vector.broadcast %cst : f32 to vector<8x128xf32>
    %c0_i32_1 = arith.constant 0 : i32
    %c8_i32 = arith.constant 8 : i32
    %4 = arith.muli %c0_i32_1, %c8_i32 : i32
    %5 = tpu.assume_multiple %4, 8 : i32
    %6 = arith.index_cast %5 : i32 to index
    %c0 = arith.constant 0 : index
    %7 = vector.load %arg2[%6, %c0] : memref<16x128xf32, #tpu.memory_space<vmem>>, vector<8x128xf32>
    %8 = arith.addf %3, %7 : vector<8x128xf32>
    %9 = arith.mulf %7, %7 : vector<8x128xf32>
    %10 = arith.addf %3, %9 : vector<8x128xf32>
    %c1_i32 = arith.constant 1 : i32
    %c8_i32_2 = arith.constant 8 : i32
    %11 = arith.muli %c1_i32, %c8_i32_2 : i32
    %12 = tpu.assume_multiple %11, 8 : i32
    %13 = arith.index_cast %12 : i32 to index
    %c0_3 = arith.constant 0 : index
    %14 = vector.load %arg2[%13, %c0_3] : memref<16x128xf32, #tpu.memory_space<vmem>>, vector<8x128xf32>
    %15 = arith.addf %8, %14 : vector<8x128xf32>
    %16 = arith.mulf %14, %14 : vector<8x128xf32>
    %17 = arith.addf %10, %16 : vector<8x128xf32>
    %c2_i32 = arith.constant 2 : i32
    %c0_4 = arith.constant 0 : index
    %c0_5 = arith.constant 0 : index
    %18 = vector.load %arg4[%c0_4, %c0_5] : memref<8x128xf32, #tpu.memory_space<vmem>>, vector<8x128xf32>
    %19 = arith.addf %18, %15 : vector<8x128xf32>
    %c0_6 = arith.constant 0 : index
    %c0_7 = arith.constant 0 : index
    %20 = vector.load %arg4[%c0_6, %c0_7] : memref<8x128xf32, #tpu.memory_space<vmem>>, vector<8x128xf32>
    tpu.vector_store %arg4[%c0_6, %c0_7], %19 {strides = array<i32>} : memref<8x128xf32, #tpu.memory_space<vmem>>, vector<8x128xf32>,
    %c0_8 = arith.constant 0 : index
    %c0_9 = arith.constant 0 : index
    %21 = vector.load %arg5[%c0_8, %c0_9] : memref<8x128xf32, #tpu.memory_space<vmem>>, vector<8x128xf32>
    %22 = arith.addf %21, %17 : vector<8x128xf32>
    %c0_10 = arith.constant 0 : index
    %c0_11 = arith.constant 0 : index
    %23 = vector.load %arg5[%c0_10, %c0_11] : memref<8x128xf32, #tpu.memory_space<vmem>>, vector<8x128xf32>
    tpu.vector_store %arg5[%c0_10, %c0_11], %22 {strides = array<i32>} : memref<8x128xf32, #tpu.memory_space<vmem>>, vector<8x128xf32>,
    %c0_i32_12 = arith.constant 0 : i32
    %24 = arith.cmpi eq, %arg1, %c0_i32_12 : i32
    %25 = arith.extui %24 : i1 to i32
    %c0_i32_13 = arith.constant 0 : i32
    %26 = arith.cmpi ne, %25, %c0_i32_13 : i32
    scf.if %26 {
      %c0_14 = arith.constant 0 : index
      %c0_15 = arith.constant 0 : index
      %27 = vector.load %arg4[%c0_14, %c0_15] : memref<8x128xf32, #tpu.memory_space<vmem>>, vector<8x128xf32>
      %28 = vector.shape_cast %27 : vector<8x128xf32> to vector<1x8x128xf32>
      %cst_16 = arith.constant dense<0.000000e+00> : vector<1xf32>
      %29 = vector.multi_reduction <add>, %28, %cst_16 [1, 2] : vector<1x8x128xf32> to vector<1xf32>
      %30 = vector.shape_cast %29 : vector<1xf32> to vector<1x1x1xf32>
      %31 = vector.extract %30[0, 0, 0] : f32 from vector<1x1x1xf32>
      %c0_17 = arith.constant 0 : index
      %c0_18 = arith.constant 0 : index
      %32 = memref.load %arg3[%c0_17, %c0_18] : memref<1x2xf32, #tpu.memory_space<smem>>
      memref.store %31, %arg3[%c0_17, %c0_18] : memref<1x2xf32, #tpu.memory_space<smem>>
      %c0_19 = arith.constant 0 : index
      %c0_20 = arith.constant 0 : index
      %33 = vector.load %arg5[%c0_19, %c0_20] : memref<8x128xf32, #tpu.memory_space<vmem>>, vector<8x128xf32>
      %34 = vector.shape_cast %33 : vector<8x128xf32> to vector<1x8x128xf32>
      %cst_21 = arith.constant dense<0.000000e+00> : vector<1xf32>
      %35 = vector.multi_reduction <add>, %34, %cst_21 [1, 2] : vector<1x8x128xf32> to vector<1xf32>
      %36 = vector.shape_cast %35 : vector<1xf32> to vector<1x1x1xf32>
      %37 = vector.extract %36[0, 0, 0] : f32 from vector<1x1x1xf32>
      %c0_22 = arith.constant 0 : index
      %c1 = arith.constant 1 : index
      %38 = memref.load %arg3[%c0_22, %c1] : memref<1x2xf32, #tpu.memory_space<smem>>
      memref.store %37, %arg3[%c0_22, %c1] : memref<1x2xf32, #tpu.memory_space<smem>>
    } else {
    }
    return
  }
  func.func @transform_0(%arg0: i32, %arg1: i32) -> (i32, i32) {
    %c1_i32 = arith.constant 1 : i32
    %0 = arith.muli %arg0, %c1_i32 : i32
    %1 = arith.addi %0, %arg1 : i32
    %c0_i32 = arith.constant 0 : i32
    %2 = arith.minsi %1, %c0_i32 : i32
    %c0_i32_0 = arith.constant 0 : i32
    %c0_i32_1 = arith.constant 0 : i32
    return %2, %c0_i32_0 : i32, i32
  }
  func.func @transform_1(%arg0: i32, %arg1: i32) -> (i32, i32) {
    %c0_i32 = arith.constant 0 : i32
    %c0_i32_0 = arith.constant 0 : i32
    return %arg0, %c0_i32 : i32, i32
  }
}

</mosaic_0001>

<bundles_post_ra>
// kernel: tpu_custom_call.1
= control target key start
LH: loop header
LB: loop body
LE: loop exit
PB: predicated region body
PF: predicated region fallthrough
CT: control target
= control target key end

     0   :  { %6 = vsyncpa [#allocation5], 0  ;;  %s179_s0 = inlined_call_operand.hbm [shape: f32[16,128], index: 0, kind: input, shape index: {}]   ;;  %s180_s1 = inlined_call_operand.hbm [shape: f32[1,2], index: 1, kind: output, shape index: {}]  }
   0x1   :  { %7 = vsyncpa [#allocation6], 0  ;;  %s141_s6 = smov [#allocation4]   ;;  %s105_s10 = scalar_lea.hbm %s179_s0, 256 }
   0x2   :  { %s19_s7 = sshll.u32 %s141_s6, 4  ;;  %p106_p0 = scmp.ne.s32.totalorder %s179_s0, %s105_s10  ;;  %s20_s7 = int_to_ptr.vmem [resolvable:$true] %s19_s7 }
   0x3   :  { %p109_p1 = scmp.lt.u32.totalorder %s105_s10, %s179_s0 }
   0x5   :  { %p111_p2 = pnand %p109_p1, %p106_p0 }
   0x7   :  { %114 = shalt.err (!%p111_p2)
}
   0x8   :  { %s115_s15 = scalar_lea.vmem %s20_s7, 256  ;;  %p120_p4 = scmp.lt.s32.totalorder %s20_s7, %s20_s7 }
   0x9   :  { %p116_p3 = scmp.ne.s32.totalorder %s20_s7, %s115_s15  ;;  %p121_p5 = scmp.lt.s32.totalorder %s115_s15, %s115_s15 }
   0xb   :  { %p122_p6 = por %p121_p5, %p120_p4 }
   0xd   :  { %p123_p7 = pnand %p122_p6, %p116_p3 }
   0xf   :  { %126 = shalt.err (!%p123_p7)
}
  0x10   :  { %s142_s16 = smov 128   ;;  %s143_s17 = smov 8  }
  0x11   :  { %25 = dma.hbm_to_vmem [thread:$0]  %s179_s0, 256, %s20_s7, [#allocation5], %s142_s16, %s142_s16, %s143_s17  }
  0x12   :  { %137 = dma.done.wait [#allocation5], 256  }
  0x13   :  { %138 = vsyncadd [#allocation5], 4294967040  ;;  %v39_v0 = vld [vmem:[#allocation4] sm:$0xff]  ;;  %v44_v1 = vld [vmem:[#allocation4 + $0x8] sm:$0xff]  ;;  %s127_s23 = scalar_lea.hbm %s180_s1, 16 }
  0x14   :  { %v45_v2 = vadd.f32 %v44_v1, %v39_v0  ;;  %v46_v3 = vmul.f32 %v44_v1, %v44_v1  ;;  %v41_v4 = vmul.f32 %v39_v0, %v39_v0  ;;  %p128_p8 = scmp.ne.s32.totalorder %s180_s1, %s127_s23  ;;  %p131_p9 = scmp.lt.u32.totalorder %s127_s23, %s180_s1 }
  0x16   :  { %58 = vadd.xlane.f32.xlu0 %v45_v2  ;;  %v47_v5 = vadd.f32 %v46_v3, %v41_v4  ;;  %p133_p10 = pnand %p131_p9, %p128_p8 }
  0x1a   :  { %70 = vadd.xlane.f32.xlu0 %v47_v5 }
  0xa3   :  { %v59_v6 = vpop.xlane.xlu0 %58 }
  0xa4   :  { %v60_v7 = vrot.slane %v59_v6, 4 }
  0xa6   :  { %v61_v8 = vadd.f32 %v60_v7, %v59_v6 }
  0xa7   :  { %v71_v9 = vpop.xlane.xlu0 %70 }
  0xa8   :  { %v62_v10 = vrot.slane %v61_v8, 2  ;;  %v72_v11 = vrot.slane %v71_v9, 4 }
  0xaa   :  { %v73_v12 = vadd.f32 %v72_v11, %v71_v9  ;;  %v63_v13 = vadd.f32 %v62_v10, %v61_v8 }
  0xac   :  { %v74_v14 = vrot.slane %v73_v12, 2  ;;  %v64_v15 = vrot.slane %v63_v13, 1 }
  0xae   :  { %v75_v16 = vadd.f32 %v74_v14, %v73_v12  ;;  %v65_v17 = vadd.f32 %v64_v15, %v63_v13 }
  0xb0   :  { %97 = vpush %v65_v17  ;;  %v76_v18 = vrot.slane %v75_v16, 1 }
  0xb2   :  { %v77_v19 = vadd.f32 %v76_v18, %v75_v16 }
  0xb4   :  { %99 = vpush %v77_v19 }
  0xe1   :  { %s98_s0 = spop %97 }
  0xe2   :  { %68 = sst [smem:[#allocation7]] %s98_s0 }
  0xe5   :  { %s100_s20 = spop %99 }
  0xe6   :  { %80 = sst [smem:[#allocation7 + $0x1]] %s100_s20 }
  0xe7   :  { %136 = shalt.err (!%p133_p10)
}
  0xe8   :  { %s144_s28 = smov [#allocation7]  }
  0xe9   :  { %88 = dma.smem_to_hbm %s144_s28, 16, %s180_s1, [#allocation6]  }
  0xea   :  { %139 = dma.done.wait [#allocation6], 16  }
  0xeb   :  { %140 = vsyncadd [#allocation6], 4294967280 }
  0xec   :  { %92 = sfence }
  0xed   :  { %93 = vsyncpa [#allocation5], 1 }
  0xee   :  { %94 = vsyncpa [#allocation6], 1 }

</bundles_post_ra>
